<compile_context>
chip_gen: v6e
topology: v6e:2x2x1
jax: 0.10.0
libtpu: 0.0.40
codegen_flags: <defaults>
</compile_context>

<pallas_src>
import functools

import jax
import jax.numpy as jnp
from jax import lax
from jax.experimental import pallas as pl
from jax.experimental.pallas import tpu as pltpu

_VMEM_LIMIT = 64 * 1024 * 1024


def _pick_row_tile(n, target):
    """Largest tile <= target dividing n, multiple of 8 (or the full extent)."""
    if n <= target:
        return n
    for t in range(target, 7, -1):
        if n % t == 0 and t % 8 == 0:
            return t
    return n


def _pick_h_tile(h, target):
    for t in range(min(target, h), 0, -1):
        if h % t == 0:
            return t
    return h


# ------------------------------------------------------------------ kernel 1
def _proj_in_kernel(x_ref, wa_ref, ba_ref, wb_ref, bb_ref, pwa_ref, abc_ref,
                    *, mxu_dtype):
    x = x_ref[...].astype(mxu_dtype)
    pwa_ref[...] = (jnp.dot(x, wa_ref[...],
                            preferred_element_type=jnp.float32)
                    + ba_ref[...]).astype(pwa_ref.dtype)
    abc_ref[...] = (jnp.dot(x, wb_ref[...],
                            preferred_element_type=jnp.float32)
                    + bb_ref[...]).astype(abc_ref.dtype)


def proj_in(x_flat, wa, ba, wb, bb, *, tm, mxu_dtype):
    """1x1 conv producing the (pwa, abc) split directly as two outputs."""
    n, cin = x_flat.shape
    d0 = wa.shape[1]
    cs = wb.shape[1]
    assert n % tm == 0
    kern = functools.partial(_proj_in_kernel, mxu_dtype=mxu_dtype)
    return pl.pallas_call(
        kern,
        out_shape=(jax.ShapeDtypeStruct((n, d0), x_flat.dtype),
                   jax.ShapeDtypeStruct((n, cs), x_flat.dtype)),
        grid_spec=pltpu.PrefetchScalarGridSpec(
            num_scalar_prefetch=0,
            grid=(n // tm,),
            in_specs=[
                pl.BlockSpec((tm, cin), lambda i: (i, 0)),
                pl.BlockSpec((cin, d0), lambda i: (0, 0)),
                pl.BlockSpec((1, d0), lambda i: (0, 0)),
                pl.BlockSpec((cin, cs), lambda i: (0, 0)),
                pl.BlockSpec((1, cs), lambda i: (0, 0)),
            ],
            out_specs=(pl.BlockSpec((tm, d0), lambda i: (i, 0)),
                       pl.BlockSpec((tm, cs), lambda i: (i, 0))),
        ),
        compiler_params=pltpu.CompilerParams(
            dimension_semantics=("parallel",),
            vmem_limit_bytes=_VMEM_LIMIT),
    )(x_flat, wa, ba.reshape(1, d0), wb, bb.reshape(1, cs))


# ------------------------------------------------------------------ kernel 2
def _dw_chain_kernel(abc_hbm, pwa_ref, wdw_ref, bdw_ref, *rest,
                     order, dims, h_tile, W, K, scale, mxu_dtype):
    # rest = pw_w0, pw_b0, ..., pw_w_{o-2}, pw_b_{o-2}, proj_out_w, proj_out_b,
    #        o_ref, xbuf, sem, dwacc
    nw = 2 * (order - 1) + 2
    w_refs = rest[:nw]
    o_ref = rest[nw]
    xbuf = rest[nw + 1]          # VMEM (2, h_tile+K-1, W+K-1, Cs) f32
    sem = rest[nw + 2]           # DMA semaphores (2,)
    dwacc = rest[nw + 3]         # VMEM (h_tile, W, Cs) f32

    b = pl.program_id(0)
    r = pl.program_id(1)
    n_r = pl.num_programs(1)
    hp = h_tile + K - 1
    cs = sum(dims)
    rows = h_tile * W

    # ---- manually double-buffered halo DMA (rows r*h_tile .. +h_tile+6) ----
    def fetch(row_tile, slot):
        pltpu.make_async_copy(
            abc_hbm.at[b, pl.ds(row_tile * h_tile, hp)],
            xbuf.at[slot], sem.at[slot]).start()

    slot = r & 1

    @pl.when(r == 0)
    def _():                      # prime the first row tile of this batch
        fetch(0, 0)

    @pl.when(r + 1 < n_r)
    def _():                      # prefetch the next row tile
        fetch(r + 1, 1 - slot)

    pltpu.make_async_copy(abc_hbm.at[b, pl.ds(0, hp)],
                          xbuf.at[slot], sem.at[slot]).wait()

    # ---- 7x7 depthwise conv: 49 shifted MACs into a VMEM accumulator -------
    wdw = wdw_ref[...]                                  # (K, K, Cs)
    dwacc[...] = jnp.zeros_like(dwacc)
    for dy in range(K):
        band = xbuf[slot, dy:dy + h_tile]               # (h_tile, W+K-1, Cs)
        part = band[:, 0:W, :] * wdw[dy, 0, :]
        for dx in range(1, K):
            part = part + band[:, dx:dx + W, :] * wdw[dy, dx, :]
        dwacc[...] += part

    dw = ((dwacc[...] + bdw_ref[...]) * scale).reshape(rows, cs)

    offs = [0]
    for d in dims:
        offs.append(offs[-1] + d)

    # ---- recursive gating chain + proj_out (MXU matmuls, f32 accumulate) ---
    x = pwa_ref[...].reshape(rows, dims[0]) * dw[:, offs[0]:offs[1]]
    for i in range(order - 1):
        w_ref = w_refs[2 * i]
        b_ref = w_refs[2 * i + 1]
        y = jnp.dot(x.astype(mxu_dtype), w_ref[...],
                    preferred_element_type=jnp.float32) + b_ref[...]
        x = y * dw[:, offs[i + 1]:offs[i + 2]]
    wo_ref, bo_ref = w_refs[-2], w_refs[-1]
    out = jnp.dot(x.astype(mxu_dtype), wo_ref[...],
                  preferred_element_type=jnp.float32) + bo_ref[...]
    o_ref[...] = out.reshape(1, h_tile, W, dims[-1]).astype(o_ref.dtype)


# --------------------------------------------------------------- full forward
def gnconv_forward(x_nchw, params, *, order=5, scale=1.0, tm=1024,
                   h_tile=None, mxu_dtype=jnp.bfloat16):
    B, C, H, W = x_nchw.shape
    dim = C
    dims = [dim // 2 ** i for i in range(order)]
    dims.reverse()                       # ascending: [dim/2^(o-1), ..., dim]
    d0 = dims[0]
    cs = sum(dims)
    K = 7
    p = (K - 1) // 2

    x_nhwc = jnp.transpose(x_nchw, (0, 2, 3, 1))
    N = B * H * W
    x_flat = x_nhwc.reshape(N, dim)

    tm = _pick_row_tile(N, tm)
    if h_tile is None:
        h_tile = _pick_h_tile(H, 8)
    assert H % h_tile == 0

    # proj_in (1x1 conv) with the pwa/abc split fused into two kernel outputs.
    w_in = params["proj_in_w"]
    b_in = params["proj_in_b"]
    pwa_flat, abc_flat = proj_in(
        x_flat,
        w_in[:, :d0].astype(mxu_dtype), b_in[:d0],
        w_in[:, d0:].astype(mxu_dtype), b_in[d0:],
        tm=tm, mxu_dtype=mxu_dtype)

    pwa = pwa_flat.reshape(B, H, W, d0)
    abc = abc_flat.reshape(B, H, W, cs)
    # TODO(synk): generate the 3-pixel halo in-kernel (clamped DMAs + edge
    # masking) to also remove this single padded HBM copy of abc.
    abc_pad = jnp.pad(abc, ((0, 0), (p, p), (p, p), (0, 0)))

    # fused depthwise 7x7 + gating chain + proj_out
    weight_inputs, weight_specs = [], []
    for i in range(order - 1):
        w = params["pw_w"][i].astype(mxu_dtype)
        bch = params["pw_b"][i].reshape(1, -1)
        weight_inputs += [w, bch]
        weight_specs += [pl.BlockSpec(w.shape, lambda bb, rr: (0, 0)),
                         pl.BlockSpec(bch.shape, lambda bb, rr: (0, 0))]
    wo = params["proj_out_w"].astype(mxu_dtype)
    bo = params["proj_out_b"].reshape(1, -1)
    weight_inputs += [wo, bo]
    weight_specs += [pl.BlockSpec(wo.shape, lambda bb, rr: (0, 0)),
                     pl.BlockSpec(bo.shape, lambda bb, rr: (0, 0))]

    n_r = H // h_tile
    kern = functools.partial(
        _dw_chain_kernel, order=order, dims=tuple(dims), h_tile=h_tile,
        W=W, K=K, scale=scale, mxu_dtype=mxu_dtype)

    out_nhwc = pl.pallas_call(
        kern,
        out_shape=jax.ShapeDtypeStruct((B, H, W, dim), x_nchw.dtype),
        grid_spec=pltpu.PrefetchScalarGridSpec(
            num_scalar_prefetch=0,
            grid=(B, n_r),
            in_specs=[
                pl.BlockSpec(memory_space=pl.ANY),                 # abc (HBM)
                pl.BlockSpec((1, h_tile, W, d0),
                             lambda bb, rr: (bb, rr, 0, 0)),        # pwa
                pl.BlockSpec((K, K, cs), lambda bb, rr: (0, 0, 0)),  # dw w
                pl.BlockSpec((1, cs), lambda bb, rr: (0, 0)),        # dw b
            ] + weight_specs,
            out_specs=pl.BlockSpec((1, h_tile, W, dim),
                                   lambda bb, rr: (bb, rr, 0, 0)),
            scratch_shapes=[
                pltpu.VMEM((2, h_tile + K - 1, W + K - 1, cs), jnp.float32),
                pltpu.SemaphoreType.DMA((2,)),
                pltpu.VMEM((h_tile, W, cs), jnp.float32),
            ],
        ),
        compiler_params=pltpu.CompilerParams(
            dimension_semantics=("parallel", "arbitrary"),
            vmem_limit_bytes=_VMEM_LIMIT),
    )(abc_pad, pwa, params["dw_w"], params["dw_b"].reshape(1, cs),
      *weight_inputs)

    return jnp.transpose(out_nhwc, (0, 3, 1, 2))


# --------------------------------------------------------- params + reference
def init_params(key, dim, order):
    dims = [dim // 2 ** i for i in range(order)]
    dims.reverse()
    keys = iter(jax.random.split(key, 6 + 2 * (order - 1)))

    def nrm(k_, shape, s=0.1):
        return jax.random.normal(k_, shape, jnp.float32) * s

    return {
        "proj_in_w": nrm(next(keys), (dim, 2 * dim)),
        "proj_in_b": nrm(next(keys), (2 * dim,)),
        "dw_w": nrm(next(keys), (7, 7, sum(dims))),
        "dw_b": nrm(next(keys), (sum(dims),)),
        "proj_out_w": nrm(next(keys), (dim, dim)),
        "proj_out_b": nrm(next(keys), (dim,)),
        "pw_w": [nrm(next(keys), (dims[i], dims[i + 1]))
                 for i in range(order - 1)],
        "pw_b": [nrm(next(keys), (dims[i + 1],)) for i in range(order - 1)],
    }


def gnconv_reference(x_nchw, params, *, order=5, scale=1.0):
    """Pure-JAX (XLA, f32) reference, same semantics as the PyTorch module."""
    B, C, H, W = x_nchw.shape
    dim = C
    dims = [dim // 2 ** i for i in range(order)]
    dims.reverse()
    Cs = sum(dims)
    x = jnp.transpose(x_nchw, (0, 2, 3, 1))
    fused = jnp.einsum("bhwc,cd->bhwd", x, params["proj_in_w"]) \
        + params["proj_in_b"]
    pwa = fused[..., :dims[0]]
    abc = fused[..., dims[0]:]
    dw = lax.conv_general_dilated(
        abc, params["dw_w"][:, :, None, :],
        window_strides=(1, 1), padding="SAME",
        dimension_numbers=("NHWC", "HWIO", "NHWC"),
        feature_group_count=Cs) + params["dw_b"]
    dw = dw * scale
    offs = [0]
    for d in dims:
        offs.append(offs[-1] + d)
    dw_list = [dw[..., offs[i]:offs[i + 1]] for i in range(order)]
    y = pwa * dw_list[0]
    for i in range(order - 1):
        y = (jnp.einsum("bhwc,cd->bhwd", y, params["pw_w"][i])
             + params["pw_b"][i]) * dw_list[i + 1]
    y = jnp.einsum("bhwc,cd->bhwd", y, params["proj_out_w"]) \
        + params["proj_out_b"]
    return jnp.transpose(y, (0, 3, 1, 2))


if __name__ == "__main__":
    B, dim, H, W = 2, 16, 16, 16       # dim must be divisible by 2**(order-1)
    order, scale = 5, 1.0
    key = jax.random.PRNGKey(0)
    kx, kp = jax.random.split(key)
    x = jax.random.normal(kx, (B, dim, H, W), jnp.float32)
    params = init_params(kp, dim, order)

    out = gnconv_forward(x, params, order=order, scale=scale)
    out = jax.block_until_ready(out)
    assert out.shape == (B, dim, H, W)

    ref = gnconv_reference(x, params, order=order, scale=scale)
    err = float(jnp.max(jnp.abs(out - ref)))
    # bf16 MXU operands (f32 accumulation) => loosened tolerance vs f32 ref.
    assert err < 5e-2, f"max abs err {err}"
    print("KERNEL_OK")
</pallas_src>

<mosaic_0001>
module attributes {stable_mosaic.version = 11 : i64} {
  func.func @_proj_in_kernel(%arg0: i32, %arg1: memref<512x16xf32, #tpu.memory_space<vmem>>, %arg2: memref<16x1xbf16, #tpu.memory_space<vmem>>, %arg3: memref<1x1xf32, #tpu.memory_space<vmem>>, %arg4: memref<16x31xbf16, #tpu.memory_space<vmem>>, %arg5: memref<1x31xf32, #tpu.memory_space<vmem>>, %arg6: memref<512x1xf32, #tpu.memory_space<vmem>>, %arg7: memref<512x31xf32, #tpu.memory_space<vmem>>) attributes {dimension_semantics = [#tpu.dimension_semantics<parallel>], iteration_bounds = array<i64: 1>, scalar_prefetch = 0 : i64, scratch_operands = 0 : i64, tpu.core_type = #tpu.core_type<tc>, window_params = [{transform_indices = @transform_0, window_bounds = array<i64: 512, 16>}, {pipeline_mode = #tpu.pipeline_mode<synchronous>, transform_indices = @transform_1, window_bounds = array<i64: 16, 1>}, {pipeline_mode = #tpu.pipeline_mode<synchronous>, transform_indices = @transform_2, window_bounds = array<i64: 1, 1>}, {pipeline_mode = #tpu.pipeline_mode<synchronous>, transform_indices = @transform_3, window_bounds = array<i64: 16, 31>}, {pipeline_mode = #tpu.pipeline_mode<synchronous>, transform_indices = @transform_4, window_bounds = array<i64: 1, 31>}, {transform_indices = @transform_5, window_bounds = array<i64: 512, 1>}, {transform_indices = @transform_6, window_bounds = array<i64: 512, 31>}]} {
    %c0 = arith.constant 0 : index
    %c0_0 = arith.constant 0 : index
    %0 = vector.load %arg1[%c0, %c0_0] : memref<512x16xf32, #tpu.memory_space<vmem>>, vector<512x16xf32>
    %1 = arith.truncf %0 : vector<512x16xf32> to vector<512x16xbf16>
    %c0_1 = arith.constant 0 : index
    %c0_2 = arith.constant 0 : index
    %2 = vector.load %arg2[%c0_1, %c0_2] : memref<16x1xbf16, #tpu.memory_space<vmem>>, vector<16x1xbf16>
    %cst = arith.constant dense<0.000000e+00> : vector<512x1xf32>
    %3 = tpu.matmul %1, %2, %cst {dimension_numbers = #tpu.dot_dimension_numbers<[1], [0], [0], [1], [0, 0, 1, 1], [], []>} : vector<512x16xbf16>, vector<16x1xbf16>, vector<512x1xf32> -> vector<512x1xf32>
    %c0_3 = arith.constant 0 : index
    %c0_4 = arith.constant 0 : index
    %4 = vector.load %arg3[%c0_3, %c0_4] : memref<1x1xf32, #tpu.memory_space<vmem>>, vector<1x1xf32>
    %5 = vector.broadcast %4 : vector<1x1xf32> to vector<512x1xf32>
    %6 = arith.addf %3, %5 : vector<512x1xf32>
    %c0_5 = arith.constant 0 : index
    %c0_6 = arith.constant 0 : index
    %7 = vector.load %arg6[%c0_5, %c0_6] : memref<512x1xf32, #tpu.memory_space<vmem>>, vector<512x1xf32>
    tpu.vector_store %arg6[%c0_5, %c0_6], %6 {strides = array<i32>} : memref<512x1xf32, #tpu.memory_space<vmem>>, vector<512x1xf32>,
    %c0_7 = arith.constant 0 : index
    %c0_8 = arith.constant 0 : index
    %8 = vector.load %arg4[%c0_7, %c0_8] : memref<16x31xbf16, #tpu.memory_space<vmem>>, vector<16x31xbf16>
    %cst_9 = arith.constant dense<0.000000e+00> : vector<512x31xf32>
    %9 = tpu.matmul %1, %8, %cst_9 {dimension_numbers = #tpu.dot_dimension_numbers<[1], [0], [0], [1], [0, 0, 1, 1], [], []>} : vector<512x16xbf16>, vector<16x31xbf16>, vector<512x31xf32> -> vector<512x31xf32>
    %c0_10 = arith.constant 0 : index
    %c0_11 = arith.constant 0 : index
    %10 = vector.load %arg5[%c0_10, %c0_11] : memref<1x31xf32, #tpu.memory_space<vmem>>, vector<1x31xf32>
    %11 = vector.broadcast %10 : vector<1x31xf32> to vector<512x31xf32>
    %12 = arith.addf %9, %11 : vector<512x31xf32>
    %c0_12 = arith.constant 0 : index
    %c0_13 = arith.constant 0 : index
    %13 = vector.load %arg7[%c0_12, %c0_13] : memref<512x31xf32, #tpu.memory_space<vmem>>, vector<512x31xf32>
    tpu.vector_store %arg7[%c0_12, %c0_13], %12 {strides = array<i32>} : memref<512x31xf32, #tpu.memory_space<vmem>>, vector<512x31xf32>,
    return
  }
  func.func @transform_0(%arg0: i32) -> (i32, i32) {
    %c0_i32 = arith.constant 0 : i32
    %c0_i32_0 = arith.constant 0 : i32
    return %arg0, %c0_i32 : i32, i32
  }
  func.func @transform_1(%arg0: i32) -> (i32, i32) {
    %c0_i32 = arith.constant 0 : i32
    %c0_i32_0 = arith.constant 0 : i32
    %c0_i32_1 = arith.constant 0 : i32
    return %c0_i32, %c0_i32_0 : i32, i32
  }
  func.func @transform_2(%arg0: i32) -> (i32, i32) {
    %c0_i32 = arith.constant 0 : i32
    %c0_i32_0 = arith.constant 0 : i32
    %c0_i32_1 = arith.constant 0 : i32
    return %c0_i32, %c0_i32_0 : i32, i32
  }
  func.func @transform_3(%arg0: i32) -> (i32, i32) {
    %c0_i32 = arith.constant 0 : i32
    %c0_i32_0 = arith.constant 0 : i32
    %c0_i32_1 = arith.constant 0 : i32
    return %c0_i32, %c0_i32_0 : i32, i32
  }
  func.func @transform_4(%arg0: i32) -> (i32, i32) {
    %c0_i32 = arith.constant 0 : i32
    %c0_i32_0 = arith.constant 0 : i32
    %c0_i32_1 = arith.constant 0 : i32
    return %c0_i32, %c0_i32_0 : i32, i32
  }
  func.func @transform_5(%arg0: i32) -> (i32, i32) {
    %c0_i32 = arith.constant 0 : i32
    %c0_i32_0 = arith.constant 0 : i32
    return %arg0, %c0_i32 : i32, i32
  }
  func.func @transform_6(%arg0: i32) -> (i32, i32) {
    %c0_i32 = arith.constant 0 : i32
    %c0_i32_0 = arith.constant 0 : i32
    return %arg0, %c0_i32 : i32, i32
  }
}

</mosaic_0001>

<bundles_post_ra>
// kernel: tpu_custom_call.1
= control target key start
LH: loop header
LB: loop body
LE: loop exit
PB: predicated region body
PF: predicated region fallthrough
CT: control target
= control target key end

     0   :  { %vm136_vm0 = vcmask 130048   ;;  %vm522_vm1 = vcmask 7168   ;;  %vm891_vm2 = vcmask 252928   ;;  %s2179_s1 = inlined_call_operand.vmem [shape: bf16[16,1], index: 1, kind: input, shape index: {}]   ;;  %s2180_s3 = inlined_call_operand.vmem [shape: bf16[16,31], index: 3, kind: input, shape index: {}]   ;;  %s2181_s0 = inlined_call_operand.vmem [shape: f32[512,16], index: 0, kind: input, shape index: {}]   ;;  %s2182_s2 = inlined_call_operand.<no memory space> [shape: f32[1,1], index: 2, kind: input, shape index: {}]   ;;  %s2183_s4 = inlined_call_operand.vmem [shape: f32[1,31], index: 4, kind: input, shape index: {}]   ;;  %s2184_s5 = inlined_call_operand.vmem [shape: f32[512,1], index: 5, kind: output, shape index: {0}]   ;;  %s2185_s6 = inlined_call_operand.vmem [shape: f32[512,31], index: 6, kind: output, shape index: {1}]  }
   0x1   :  { %v1230_v0 = vld [vmem:[%s2179_s1] sm:$0xff]   ;;  %v12_v1 = vstv %s2182_s2  ;;  %v26_v4 = vld [vmem:[%s2181_s0 + $0x8] sm:$0xff]  ;;  %v27_v5 = vld [vmem:[%s2181_s0 + $0x10] sm:$0xff] }
   0x2   :  { %v1231_v2 = vld [vmem:[%s2180_s3] sm:$0xff]   ;;  %13 = vst [vmem:[#allocation2] sm:$0x1] %v12_v1  ;;  %1098 = vmatprep.subr.bf16.mxu0 %v1230_v0  ;;  %v28_v7 = vld [vmem:[%s2181_s0 + $0x18] sm:$0xff]  ;;  %v30_v9 = vld [vmem:[%s2181_s0 + $0x28] sm:$0xff] }
   0x3   :  { %v25_v3 = vld [vmem:[%s2181_s0] sm:$0xff]  ;;  %1164 = vmatprep.subr.bf16.mxu1 %v1231_v2  ;;  %1099 = vmatpush3.bf16.msra.mxu0 %v1230_v0  ;;  %v90_v10 = vpack.c.bf16 %v28_v7, %v27_v5  ;;  %v31_v12 = vld [vmem:[%s2181_s0 + $0x30] sm:$0xff]  ;;  %v32_v13 = vld [vmem:[%s2181_s0 + $0x38] sm:$0xff] }
   0x4   :  { %v89_v6 = vpack.c.bf16 %v26_v4, %v25_v3  ;;  %v29_v8 = vld [vmem:[%s2181_s0 + $0x20] sm:$0xff]  ;;  %1165 = vmatpush3.bf16.msra.mxu1 %v1231_v2  ;;  %v34_v15 = vld [vmem:[%s2181_s0 + $0x48] sm:$0xff]  ;;  %v92_v16 = vpack.c.bf16 %v32_v13, %v31_v12  ;;  %v35_v18 = vld [vmem:[%s2181_s0 + $0x50] sm:$0xff] }
   0x5   :  { %v91_v11 = vpack.c.bf16 %v30_v9, %v29_v8  ;;  %v33_v14 = vld [vmem:[%s2181_s0 + $0x40] sm:$0xff]  ;;  %v36_v19 = vld [vmem:[%s2181_s0 + $0x58] sm:$0xff]  ;;  %v38_v21 = vld [vmem:[%s2181_s0 + $0x68] sm:$0xff] }
   0x6   :  { %1100 = vmatprep.mubr.msk.bf16.mxu0 %vm136_vm0, %v89_v6  ;;  %1166 = vmatprep.mubr.msk.bf16.mxu1 %vm136_vm0, %v89_v6  ;;  %v93_v17 = vpack.c.bf16 %v34_v15, %v33_v14  ;;  %v37_v20 = vld [vmem:[%s2181_s0 + $0x60] sm:$0xff]  ;;  %v94_v22 = vpack.c.bf16 %v36_v19, %v35_v18  ;;  %v39_v24 = vld [vmem:[%s2181_s0 + $0x70] sm:$0xff]  ;;  %v40_v25 = vld [vmem:[%s2181_s0 + $0x78] sm:$0xff] }
   0x7   :  { %1101 = vmatmul.mubr.msk.bf16.vlgmr.msra.gmra.mxu0 %vm136_vm0, %v90_v10  ;;  %1167 = vmatmul.mubr.msk.bf16.vlgmr.msra.gmra.mxu1 %vm136_vm0, %v90_v10  ;;  %v95_v23 = vpack.c.bf16 %v38_v21, %v37_v20  ;;  %v41_v26 = vld [vmem:[%s2181_s0 + $0x80] sm:$0xff]  ;;  %v42_v27 = vld [vmem:[%s2181_s0 + $0x88] sm:$0xff]  ;;  %v96_v28 = vpack.c.bf16 %v40_v25, %v39_v24  ;;  %v43_v30 = vld [vmem:[%s2181_s0 + $0x90] sm:$0xff] }
   0x8   :  { %1104 = vmatprep.mubr.msk.bf16.mxu0 %vm136_vm0, %v91_v11  ;;  %1170 = vmatprep.mubr.msk.bf16.mxu1 %vm136_vm0, %v91_v11  ;;  %v97_v29 = vpack.c.bf16 %v42_v27, %v41_v26  ;;  %v44_v31 = vld [vmem:[%s2181_s0 + $0x98] sm:$0xff]  ;;  %v45_v32 = vld [vmem:[%s2181_s0 + $0xa0] sm:$0xff]  ;;  %v46_v33 = vld [vmem:[%s2181_s0 + $0xa8] sm:$0xff] }
   0x9   :  { %v98_v34 = vpack.c.bf16 %v44_v31, %v43_v30  ;;  %v99_v35 = vpack.c.bf16 %v46_v33, %v45_v32  ;;  %v47_v36 = vld [vmem:[%s2181_s0 + $0xb0] sm:$0xff]  ;;  %v48_v37 = vld [vmem:[%s2181_s0 + $0xb8] sm:$0xff]  ;;  %v49_v38 = vld [vmem:[%s2181_s0 + $0xc0] sm:$0xff] }
   0xa   :  { %v50_v39 = vld [vmem:[%s2181_s0 + $0xc8] sm:$0xff]  ;;  %v100_v40 = vpack.c.bf16 %v48_v37, %v47_v36  ;;  %v51_v42 = vld [vmem:[%s2181_s0 + $0xd0] sm:$0xff]  ;;  %v52_v43 = vld [vmem:[%s2181_s0 + $0xd8] sm:$0xff] }
   0xb   :  { %v101_v41 = vpack.c.bf16 %v50_v39, %v49_v38  ;;  %v53_v44 = vld [vmem:[%s2181_s0 + $0xe0] sm:$0xff]  ;;  %v54_v45 = vld [vmem:[%s2181_s0 + $0xe8] sm:$0xff]  ;;  %v102_v46 = vpack.c.bf16 %v52_v43, %v51_v42  ;;  %v55_v48 = vld [vmem:[%s2181_s0 + $0xf0] sm:$0xff] }
   0xc   :  { %v103_v47 = vpack.c.bf16 %v54_v45, %v53_v44  ;;  %v56_v49 = vld [vmem:[%s2181_s0 + $0xf8] sm:$0xff]  ;;  %v57_v50 = vld [vmem:[%s2181_s0 + $0x100] sm:$0xff]  ;;  %v58_v51 = vld [vmem:[%s2181_s0 + $0x108] sm:$0xff] }
   0xd   :  { %v104_v52 = vpack.c.bf16 %v56_v49, %v55_v48  ;;  %v105_v53 = vpack.c.bf16 %v58_v51, %v57_v50  ;;  %v59_v54 = vld [vmem:[%s2181_s0 + $0x110] sm:$0xff]  ;;  %v60_v55 = vld [vmem:[%s2181_s0 + $0x118] sm:$0xff]  ;;  %v61_v56 = vld [vmem:[%s2181_s0 + $0x120] sm:$0xff] }
   0xe   :  { %v62_v57 = vld [vmem:[%s2181_s0 + $0x128] sm:$0xff]  ;;  %v106_v58 = vpack.c.bf16 %v60_v55, %v59_v54  ;;  %v63_v60 = vld [vmem:[%s2181_s0 + $0x130] sm:$0xff]  ;;  %v64_v61 = vld [vmem:[%s2181_s0 + $0x138] sm:$0xff] }
   0xf   :  { %1105 = vmatmul.mubr.msk.bf16.gmra.mxu0 %vm136_vm0, %v92_v16  ;;  %1171 = vmatmul.mubr.msk.bf16.gmra.mxu1 %vm136_vm0, %v92_v16  ;;  %v107_v59 = vpack.c.bf16 %v62_v57, %v61_v56  ;;  %v65_v62 = vld [vmem:[%s2181_s0 + $0x140] sm:$0xff]  ;;  %v66_v63 = vld [vmem:[%s2181_s0 + $0x148] sm:$0xff]  ;;  %v108_v0 = vpack.c.bf16 %v64_v61, %v63_v60  ;;  %v67_v2 = vld [vmem:[%s2181_s0 + $0x150] sm:$0xff] }
  0x10   :  { %1108 = vmatprep.mubr.msk.bf16.mxu0 %vm136_vm0, %v93_v17  ;;  %1174 = vmatprep.mubr.msk.bf16.mxu1 %vm136_vm0, %v93_v17  ;;  %v109_v1 = vpack.c.bf16 %v66_v63, %v65_v62  ;;  %v68_v3 = vld [vmem:[%s2181_s0 + $0x158] sm:$0xff]  ;;  %v69_v4 = vld [vmem:[%s2181_s0 + $0x160] sm:$0xff]  ;;  %v70_v5 = vld [vmem:[%s2181_s0 + $0x168] sm:$0xff] }
  0x11   :  { %v110_v6 = vpack.c.bf16 %v68_v3, %v67_v2  ;;  %v111_v7 = vpack.c.bf16 %v70_v5, %v69_v4  ;;  %v71_v8 = vld [vmem:[%s2181_s0 + $0x170] sm:$0xff]  ;;  %v72_v9 = vld [vmem:[%s2181_s0 + $0x178] sm:$0xff]  ;;  %v73_v10 = vld [vmem:[%s2181_s0 + $0x180] sm:$0xff] }
  0x12   :  { %v74_v11 = vld [vmem:[%s2181_s0 + $0x188] sm:$0xff]  ;;  %v112_v12 = vpack.c.bf16 %v72_v9, %v71_v8  ;;  %v75_v14 = vld [vmem:[%s2181_s0 + $0x190] sm:$0xff]  ;;  %v76_v15 = vld [vmem:[%s2181_s0 + $0x198] sm:$0xff] }
  0x13   :  { %v113_v13 = vpack.c.bf16 %v74_v11, %v73_v10  ;;  %v77_v16 = vld [vmem:[%s2181_s0 + $0x1a0] sm:$0xff]  ;;  %v78_v17 = vld [vmem:[%s2181_s0 + $0x1a8] sm:$0xff]  ;;  %v114_v18 = vpack.c.bf16 %v76_v15, %v75_v14  ;;  %v79_v20 = vld [vmem:[%s2181_s0 + $0x1b0] sm:$0xff] }
  0x14   :  { %v115_v19 = vpack.c.bf16 %v78_v17, %v77_v16  ;;  %v80_v21 = vld [vmem:[%s2181_s0 + $0x1b8] sm:$0xff]  ;;  %v83_v26 = vld [vmem:[%s2181_s0 + $0x1d0] sm:$0xff]  ;;  %v1537_v36 = vld [vmem:[%s2183_s4] ss:$0 sm:$0xff] }
  0x15   :  { %v116_v24 = vpack.c.bf16 %v80_v21, %v79_v20  ;;  %v84_v27 = vld [vmem:[%s2181_s0 + $0x1d8] sm:$0xff]  ;;  %v87_v32 = vld [vmem:[%s2181_s0 + $0x1f0] sm:$0xff] }
  0x16   :  { %v118_v30 = vpack.c.bf16 %v84_v27, %v83_v26  ;;  %v88_v33 = vld [vmem:[%s2181_s0 + $0x1f8] sm:$0xff] }
  0x17   :  { %1109 = vmatmul.mubr.msk.bf16.gmra.mxu0 %vm136_vm0, %v94_v22  ;;  %1175 = vmatmul.mubr.msk.bf16.gmra.mxu1 %vm136_vm0, %v94_v22  ;;  %v81_v22 = vld [vmem:[%s2181_s0 + $0x1c0] sm:$0xff] }
  0x18   :  { %1112 = vmatprep.mubr.msk.bf16.mxu0 %vm136_vm0, %v95_v23  ;;  %1178 = vmatprep.mubr.msk.bf16.mxu1 %vm136_vm0, %v95_v23  ;;  %v82_v23 = vld [vmem:[%s2181_s0 + $0x1c8] sm:$0xff] }
  0x19   :  { %v117_v25 = vpack.c.bf16 %v82_v23, %v81_v22 }
  0x1f   :  { %1113 = vmatmul.mubr.msk.bf16.gmra.mxu0 %vm136_vm0, %v96_v28  ;;  %1179 = vmatmul.mubr.msk.bf16.gmra.mxu1 %vm136_vm0, %v96_v28  ;;  %v85_v28 = vld [vmem:[%s2181_s0 + $0x1e0] sm:$0xff] }
  0x20   :  { %1116 = vmatprep.mubr.msk.bf16.mxu0 %vm136_vm0, %v97_v29  ;;  %1182 = vmatprep.mubr.msk.bf16.mxu1 %vm136_vm0, %v97_v29  ;;  %v86_v29 = vld [vmem:[%s2181_s0 + $0x1e8] sm:$0xff] }
  0x21   :  { %v119_v31 = vpack.c.bf16 %v86_v29, %v85_v28 }
  0x27   :  { %1117 = vmatmul.mubr.msk.bf16.gmra.mxu0 %vm136_vm0, %v98_v34  ;;  %1183 = vmatmul.mubr.msk.bf16.gmra.mxu1 %vm136_vm0, %v98_v34  ;;  %v120_v34 = vpack.c.bf16 %v88_v33, %v87_v32 }
  0x28   :  { %1120 = vmatprep.mubr.msk.bf16.mxu0 %vm136_vm0, %v99_v35  ;;  %1186 = vmatprep.mubr.msk.bf16.mxu1 %vm136_vm0, %v99_v35  ;;  %v1532_v35 = vld [vmem:[#allocation2] ss:$0 sm:$0xff] }
  0x2f   :  { %1121 = vmatmul.mubr.msk.bf16.gmra.mxu0 %vm136_vm0, %v100_v40  ;;  %1187 = vmatmul.mubr.msk.bf16.gmra.mxu1 %vm136_vm0, %v100_v40 }
  0x30   :  { %1124 = vmatprep.mubr.msk.bf16.mxu0 %vm136_vm0, %v101_v41  ;;  %1190 = vmatprep.mubr.msk.bf16.mxu1 %vm136_vm0, %v101_v41 }
  0x37   :  { %1125 = vmatmul.mubr.msk.bf16.gmra.mxu0 %vm136_vm0, %v102_v46  ;;  %1191 = vmatmul.mubr.msk.bf16.gmra.mxu1 %vm136_vm0, %v102_v46 }
  0x38   :  { %1128 = vmatprep.mubr.msk.bf16.mxu0 %vm136_vm0, %v103_v47  ;;  %1194 = vmatprep.mubr.msk.bf16.mxu1 %vm136_vm0, %v103_v47 }
  0x3f   :  { %1129 = vmatmul.mubr.msk.bf16.gmra.mxu0 %vm136_vm0, %v104_v52  ;;  %1195 = vmatmul.mubr.msk.bf16.gmra.mxu1 %vm136_vm0, %v104_v52 }
  0x40   :  { %1132 = vmatprep.mubr.msk.bf16.mxu0 %vm136_vm0, %v105_v53  ;;  %1198 = vmatprep.mubr.msk.bf16.mxu1 %vm136_vm0, %v105_v53 }
  0x47   :  { %1133 = vmatmul.mubr.msk.bf16.gmra.mxu0 %vm136_vm0, %v106_v58  ;;  %1199 = vmatmul.mubr.msk.bf16.gmra.mxu1 %vm136_vm0, %v106_v58 }
  0x48   :  { %1136 = vmatprep.mubr.msk.bf16.mxu0 %vm136_vm0, %v107_v59  ;;  %1202 = vmatprep.mubr.msk.bf16.mxu1 %vm136_vm0, %v107_v59 }
  0x4f   :  { %1137 = vmatmul.mubr.msk.bf16.gmra.mxu0 %vm136_vm0, %v108_v0  ;;  %1203 = vmatmul.mubr.msk.bf16.gmra.mxu1 %vm136_vm0, %v108_v0 }
  0x50   :  { %1140 = vmatprep.mubr.msk.bf16.mxu0 %vm136_vm0, %v109_v1  ;;  %1206 = vmatprep.mubr.msk.bf16.mxu1 %vm136_vm0, %v109_v1 }
  0x57   :  { %1141 = vmatmul.mubr.msk.bf16.gmra.mxu0 %vm136_vm0, %v110_v6  ;;  %1207 = vmatmul.mubr.msk.bf16.gmra.mxu1 %vm136_vm0, %v110_v6 }
  0x58   :  { %1144 = vmatprep.mubr.msk.bf16.mxu0 %vm136_vm0, %v111_v7  ;;  %1210 = vmatprep.mubr.msk.bf16.mxu1 %vm136_vm0, %v111_v7 }
  0x5f   :  { %1145 = vmatmul.mubr.msk.bf16.gmra.mxu0 %vm136_vm0, %v112_v12  ;;  %1211 = vmatmul.mubr.msk.bf16.gmra.mxu1 %vm136_vm0, %v112_v12 }
  0x60   :  { %1148 = vmatprep.mubr.msk.bf16.mxu0 %vm136_vm0, %v113_v13  ;;  %1214 = vmatprep.mubr.msk.bf16.mxu1 %vm136_vm0, %v113_v13 }
  0x67   :  { %1149 = vmatmul.mubr.msk.bf16.gmra.mxu0 %vm136_vm0, %v114_v18  ;;  %1215 = vmatmul.mubr.msk.bf16.gmra.mxu1 %vm136_vm0, %v114_v18 }
  0x68   :  { %1152 = vmatprep.mubr.msk.bf16.mxu0 %vm136_vm0, %v115_v19  ;;  %1218 = vmatprep.mubr.msk.bf16.mxu1 %vm136_vm0, %v115_v19 }
  0x6f   :  { %1153 = vmatmul.mubr.msk.bf16.gmra.mxu0 %vm136_vm0, %v116_v24  ;;  %1219 = vmatmul.mubr.msk.bf16.gmra.mxu1 %vm136_vm0, %v116_v24 }
  0x70   :  { %1156 = vmatprep.mubr.msk.bf16.mxu0 %vm136_vm0, %v117_v25  ;;  %1222 = vmatprep.mubr.msk.bf16.mxu1 %vm136_vm0, %v117_v25 }
  0x77   :  { %1157 = vmatmul.mubr.msk.bf16.gmra.mxu0 %vm136_vm0, %v118_v30  ;;  %1223 = vmatmul.mubr.msk.bf16.gmra.mxu1 %vm136_vm0, %v118_v30 }
  0x78   :  { %1160 = vmatprep.mubr.msk.bf16.mxu0 %vm136_vm0, %v119_v31  ;;  %1226 = vmatprep.mubr.msk.bf16.mxu1 %vm136_vm0, %v119_v31 }
  0x7f   :  { %1161 = vmatmul.mubr.msk.bf16.gmra.mxu0 %vm136_vm0, %v120_v34  ;;  %1227 = vmatmul.mubr.msk.bf16.gmra.mxu1 %vm136_vm0, %v120_v34 }
  0xc7   :  { %v1102_v37 = vpop.f32.mrf.mxu0  ;;  %v1168_v39 = vpop.f32.mrf.mxu1 }
  0xc8   :  { %v276_v38 = vadd.f32 %v1102_v37, %v1532_v35  ;;  %v645_v40 = vadd.f32 %v1168_v39, %v1537_v36 }
  0xc9   :  { %v267_v41 = vpop.f32.mrf.mxu0  ;;  %v636_v43 = vpop.f32.mrf.mxu1 }
  0xca   :  { %525 = vst.msk [vmem:[%s2184_s5 + $0x10] sm:$0xff] %vm522_vm1, %v276_v38  ;;  %v268_v42 = vadd.f32 %v1532_v35, %v267_v41  ;;  %v637_v44 = vadd.f32 %v1537_v36, %v636_v43 }
  0xcb   :  { %894 = vst.msk [vmem:[%s2185_s6 + $0x10] sm:$0xff] %vm891_vm2, %v645_v40  ;;  %v1103_v45 = vpop.f32.mrf.mxu0  ;;  %v1169_v47 = vpop.f32.mrf.mxu1 }
  0xcc   :  { %523 = vst.msk [vmem:[%s2184_s5] sm:$0xff] %vm522_vm1, %v268_v42  ;;  %v279_v46 = vadd.f32 %v1103_v45, %v1532_v35  ;;  %v648_v48 = vadd.f32 %v1169_v47, %v1537_v36 }
  0xcd   :  { %892 = vst.msk [vmem:[%s2185_s6] sm:$0xff] %vm891_vm2, %v637_v44  ;;  %v270_v49 = vpop.f32.mrf.mxu0  ;;  %v639_v51 = vpop.f32.mrf.mxu1 }
  0xce   :  { %526 = vst.msk [vmem:[%s2184_s5 + $0x18] sm:$0xff] %vm522_vm1, %v279_v46  ;;  %v271_v50 = vadd.f32 %v1532_v35, %v270_v49  ;;  %v640_v52 = vadd.f32 %v1537_v36, %v639_v51 }
  0xcf   :  { %895 = vst.msk [vmem:[%s2185_s6 + $0x18] sm:$0xff] %vm891_vm2, %v648_v48  ;;  %v1106_v53 = vpop.f32.mrf.mxu0  ;;  %v1172_v55 = vpop.f32.mrf.mxu1 }
  0xd0   :  { %524 = vst.msk [vmem:[%s2184_s5 + $0x8] sm:$0xff] %vm522_vm1, %v271_v50  ;;  %v292_v54 = vadd.f32 %v1106_v53, %v1532_v35  ;;  %v661_v56 = vadd.f32 %v1172_v55, %v1537_v36 }
  0xd1   :  { %893 = vst.msk [vmem:[%s2185_s6 + $0x8] sm:$0xff] %vm891_vm2, %v640_v52  ;;  %v283_v57 = vpop.f32.mrf.mxu0  ;;  %v652_v59 = vpop.f32.mrf.mxu1 }
  0xd2   :  { %529 = vst.msk [vmem:[%s2184_s5 + $0x30] sm:$0xff] %vm522_vm1, %v292_v54  ;;  %v284_v58 = vadd.f32 %v1532_v35, %v283_v57  ;;  %v653_v60 = vadd.f32 %v1537_v36, %v652_v59 }
  0xd3   :  { %898 = vst.msk [vmem:[%s2185_s6 + $0x30] sm:$0xff] %vm891_vm2, %v661_v56  ;;  %v1107_v61 = vpop.f32.mrf.mxu0  ;;  %v1173_v63 = vpop.f32.mrf.mxu1 }
  0xd4   :  { %527 = vst.msk [vmem:[%s2184_s5 + $0x20] sm:$0xff] %vm522_vm1, %v284_v58  ;;  %v295_v62 = vadd.f32 %v1107_v61, %v1532_v35  ;;  %v664_v0 = vadd.f32 %v1173_v63, %v1537_v36 }
  0xd5   :  { %896 = vst.msk [vmem:[%s2185_s6 + $0x20] sm:$0xff] %vm891_vm2, %v653_v60  ;;  %v286_v1 = vpop.f32.mrf.mxu0  ;;  %v655_v3 = vpop.f32.mrf.mxu1 }
  0xd6   :  { %530 = vst.msk [vmem:[%s2184_s5 + $0x38] sm:$0xff] %vm522_vm1, %v295_v62  ;;  %v287_v2 = vadd.f32 %v1532_v35, %v286_v1  ;;  %v656_v4 = vadd.f32 %v1537_v36, %v655_v3 }
  0xd7   :  { %899 = vst.msk [vmem:[%s2185_s6 + $0x38] sm:$0xff] %vm891_vm2, %v664_v0  ;;  %v1110_v5 = vpop.f32.mrf.mxu0  ;;  %v1176_v7 = vpop.f32.mrf.mxu1 }
  0xd8   :  { %528 = vst.msk [vmem:[%s2184_s5 + $0x28] sm:$0xff] %vm522_vm1, %v287_v2  ;;  %v308_v6 = vadd.f32 %v1110_v5, %v1532_v35  ;;  %v677_v8 = vadd.f32 %v1176_v7, %v1537_v36 }
  0xd9   :  { %897 = vst.msk [vmem:[%s2185_s6 + $0x28] sm:$0xff] %vm891_vm2, %v656_v4  ;;  %v299_v9 = vpop.f32.mrf.mxu0  ;;  %v668_v11 = vpop.f32.mrf.mxu1 }
  0xda   :  { %533 = vst.msk [vmem:[%s2184_s5 + $0x50] sm:$0xff] %vm522_vm1, %v308_v6  ;;  %v300_v10 = vadd.f32 %v1532_v35, %v299_v9  ;;  %v669_v12 = vadd.f32 %v1537_v36, %v668_v11 }
  0xdb   :  { %902 = vst.msk [vmem:[%s2185_s6 + $0x50] sm:$0xff] %vm891_vm2, %v677_v8  ;;  %v1111_v13 = vpop.f32.mrf.mxu0  ;;  %v1177_v15 = vpop.f32.mrf.mxu1 }
  0xdc   :  { %531 = vst.msk [vmem:[%s2184_s5 + $0x40] sm:$0xff] %vm522_vm1, %v300_v10  ;;  %v311_v14 = vadd.f32 %v1111_v13, %v1532_v35  ;;  %v680_v16 = vadd.f32 %v1177_v15, %v1537_v36 }
  0xdd   :  { %900 = vst.msk [vmem:[%s2185_s6 + $0x40] sm:$0xff] %vm891_vm2, %v669_v12  ;;  %v302_v17 = vpop.f32.mrf.mxu0  ;;  %v671_v19 = vpop.f32.mrf.mxu1 }
  0xde   :  { %534 = vst.msk [vmem:[%s2184_s5 + $0x58] sm:$0xff] %vm522_vm1, %v311_v14  ;;  %v303_v18 = vadd.f32 %v1532_v35, %v302_v17  ;;  %v672_v20 = vadd.f32 %v1537_v36, %v671_v19 }
  0xdf   :  { %903 = vst.msk [vmem:[%s2185_s6 + $0x58] sm:$0xff] %vm891_vm2, %v680_v16  ;;  %v1114_v21 = vpop.f32.mrf.mxu0  ;;  %v1180_v23 = vpop.f32.mrf.mxu1 }
  0xe0   :  { %532 = vst.msk [vmem:[%s2184_s5 + $0x48] sm:$0xff] %vm522_vm1, %v303_v18  ;;  %v324_v22 = vadd.f32 %v1114_v21, %v1532_v35  ;;  %v693_v24 = vadd.f32 %v1180_v23, %v1537_v36 }
  0xe1   :  { %901 = vst.msk [vmem:[%s2185_s6 + $0x48] sm:$0xff] %vm891_vm2, %v672_v20  ;;  %v315_v25 = vpop.f32.mrf.mxu0  ;;  %v684_v27 = vpop.f32.mrf.mxu1 }
  0xe2   :  { %537 = vst.msk [vmem:[%s2184_s5 + $0x70] sm:$0xff] %vm522_vm1, %v324_v22  ;;  %v316_v26 = vadd.f32 %v1532_v35, %v315_v25  ;;  %v685_v28 = vadd.f32 %v1537_v36, %v684_v27 }
  0xe3   :  { %906 = vst.msk [vmem:[%s2185_s6 + $0x70] sm:$0xff] %vm891_vm2, %v693_v24  ;;  %v1115_v29 = vpop.f32.mrf.mxu0  ;;  %v1181_v31 = vpop.f32.mrf.mxu1 }
  0xe4   :  { %535 = vst.msk [vmem:[%s2184_s5 + $0x60] sm:$0xff] %vm522_vm1, %v316_v26  ;;  %v327_v30 = vadd.f32 %v1115_v29, %v1532_v35  ;;  %v696_v32 = vadd.f32 %v1181_v31, %v1537_v36 }
  0xe5   :  { %904 = vst.msk [vmem:[%s2185_s6 + $0x60] sm:$0xff] %vm891_vm2, %v685_v28  ;;  %v318_v33 = vpop.f32.mrf.mxu0  ;;  %v687_v37 = vpop.f32.mrf.mxu1 }
  0xe6   :  { %538 = vst.msk [vmem:[%s2184_s5 + $0x78] sm:$0xff] %vm522_vm1, %v327_v30  ;;  %v319_v34 = vadd.f32 %v1532_v35, %v318_v33  ;;  %v688_v38 = vadd.f32 %v1537_v36, %v687_v37 }
  0xe7   :  { %907 = vst.msk [vmem:[%s2185_s6 + $0x78] sm:$0xff] %vm891_vm2, %v696_v32  ;;  %v1118_v39 = vpop.f32.mrf.mxu0  ;;  %v1184_v41 = vpop.f32.mrf.mxu1 }
  0xe8   :  { %536 = vst.msk [vmem:[%s2184_s5 + $0x68] sm:$0xff] %vm522_vm1, %v319_v34  ;;  %v340_v40 = vadd.f32 %v1118_v39, %v1532_v35  ;;  %v709_v42 = vadd.f32 %v1184_v41, %v1537_v36 }
  0xe9   :  { %905 = vst.msk [vmem:[%s2185_s6 + $0x68] sm:$0xff] %vm891_vm2, %v688_v38  ;;  %v331_v43 = vpop.f32.mrf.mxu0  ;;  %v700_v45 = vpop.f32.mrf.mxu1 }
  0xea   :  { %541 = vst.msk [vmem:[%s2184_s5 + $0x90] sm:$0xff] %vm522_vm1, %v340_v40  ;;  %v332_v44 = vadd.f32 %v1532_v35, %v331_v43  ;;  %v701_v46 = vadd.f32 %v1537_v36, %v700_v45 }
  0xeb   :  { %910 = vst.msk [vmem:[%s2185_s6 + $0x90] sm:$0xff] %vm891_vm2, %v709_v42  ;;  %v1119_v47 = vpop.f32.mrf.mxu0  ;;  %v1185_v49 = vpop.f32.mrf.mxu1 }
  0xec   :  { %539 = vst.msk [vmem:[%s2184_s5 + $0x80] sm:$0xff] %vm522_vm1, %v332_v44  ;;  %v343_v48 = vadd.f32 %v1119_v47, %v1532_v35  ;;  %v712_v50 = vadd.f32 %v1185_v49, %v1537_v36 }
  0xed   :  { %908 = vst.msk [vmem:[%s2185_s6 + $0x80] sm:$0xff] %vm891_vm2, %v701_v46  ;;  %v334_v51 = vpop.f32.mrf.mxu0  ;;  %v703_v53 = vpop.f32.mrf.mxu1 }
  0xee   :  { %542 = vst.msk [vmem:[%s2184_s5 + $0x98] sm:$0xff] %vm522_vm1, %v343_v48  ;;  %v335_v52 = vadd.f32 %v1532_v35, %v334_v51  ;;  %v704_v54 = vadd.f32 %v1537_v36, %v703_v53 }
  0xef   :  { %911 = vst.msk [vmem:[%s2185_s6 + $0x98] sm:$0xff] %vm891_vm2, %v712_v50  ;;  %v1122_v55 = vpop.f32.mrf.mxu0  ;;  %v1188_v57 = vpop.f32.mrf.mxu1 }
  0xf0   :  { %540 = vst.msk [vmem:[%s2184_s5 + $0x88] sm:$0xff] %vm522_vm1, %v335_v52  ;;  %v356_v56 = vadd.f32 %v1122_v55, %v1532_v35  ;;  %v725_v58 = vadd.f32 %v1188_v57, %v1537_v36 }
  0xf1   :  { %909 = vst.msk [vmem:[%s2185_s6 + $0x88] sm:$0xff] %vm891_vm2, %v704_v54  ;;  %v347_v59 = vpop.f32.mrf.mxu0  ;;  %v716_v61 = vpop.f32.mrf.mxu1 }
  0xf2   :  { %545 = vst.msk [vmem:[%s2184_s5 + $0xb0] sm:$0xff] %vm522_vm1, %v356_v56  ;;  %v348_v60 = vadd.f32 %v1532_v35, %v347_v59  ;;  %v717_v62 = vadd.f32 %v1537_v36, %v716_v61 }
  0xf3   :  { %914 = vst.msk [vmem:[%s2185_s6 + $0xb0] sm:$0xff] %vm891_vm2, %v725_v58  ;;  %v1123_v63 = vpop.f32.mrf.mxu0  ;;  %v1189_v1 = vpop.f32.mrf.mxu1 }
  0xf4   :  { %543 = vst.msk [vmem:[%s2184_s5 + $0xa0] sm:$0xff] %vm522_vm1, %v348_v60  ;;  %v359_v0 = vadd.f32 %v1123_v63, %v1532_v35  ;;  %v728_v2 = vadd.f32 %v1189_v1, %v1537_v36 }
  0xf5   :  { %912 = vst.msk [vmem:[%s2185_s6 + $0xa0] sm:$0xff] %vm891_vm2, %v717_v62  ;;  %v350_v3 = vpop.f32.mrf.mxu0  ;;  %v719_v5 = vpop.f32.mrf.mxu1 }
  0xf6   :  { %546 = vst.msk [vmem:[%s2184_s5 + $0xb8] sm:$0xff] %vm522_vm1, %v359_v0  ;;  %v351_v4 = vadd.f32 %v1532_v35, %v350_v3  ;;  %v720_v6 = vadd.f32 %v1537_v36, %v719_v5 }
  0xf7   :  { %915 = vst.msk [vmem:[%s2185_s6 + $0xb8] sm:$0xff] %vm891_vm2, %v728_v2  ;;  %v1126_v7 = vpop.f32.mrf.mxu0  ;;  %v1192_v9 = vpop.f32.mrf.mxu1 }
  0xf8   :  { %544 = vst.msk [vmem:[%s2184_s5 + $0xa8] sm:$0xff] %vm522_vm1, %v351_v4  ;;  %v372_v8 = vadd.f32 %v1126_v7, %v1532_v35  ;;  %v741_v10 = vadd.f32 %v1192_v9, %v1537_v36 }
  0xf9   :  { %913 = vst.msk [vmem:[%s2185_s6 + $0xa8] sm:$0xff] %vm891_vm2, %v720_v6  ;;  %v363_v11 = vpop.f32.mrf.mxu0  ;;  %v732_v13 = vpop.f32.mrf.mxu1 }
  0xfa   :  { %549 = vst.msk [vmem:[%s2184_s5 + $0xd0] sm:$0xff] %vm522_vm1, %v372_v8  ;;  %v364_v12 = vadd.f32 %v1532_v35, %v363_v11  ;;  %v733_v14 = vadd.f32 %v1537_v36, %v732_v13 }
  0xfb   :  { %918 = vst.msk [vmem:[%s2185_s6 + $0xd0] sm:$0xff] %vm891_vm2, %v741_v10  ;;  %v1127_v15 = vpop.f32.mrf.mxu0  ;;  %v1193_v17 = vpop.f32.mrf.mxu1 }
  0xfc   :  { %547 = vst.msk [vmem:[%s2184_s5 + $0xc0] sm:$0xff] %vm522_vm1, %v364_v12  ;;  %v375_v16 = vadd.f32 %v1127_v15, %v1532_v35  ;;  %v744_v18 = vadd.f32 %v1193_v17, %v1537_v36 }
  0xfd   :  { %916 = vst.msk [vmem:[%s2185_s6 + $0xc0] sm:$0xff] %vm891_vm2, %v733_v14  ;;  %v366_v19 = vpop.f32.mrf.mxu0  ;;  %v735_v21 = vpop.f32.mrf.mxu1 }
  0xfe   :  { %550 = vst.msk [vmem:[%s2184_s5 + $0xd8] sm:$0xff] %vm522_vm1, %v375_v16  ;;  %v367_v20 = vadd.f32 %v1532_v35, %v366_v19  ;;  %v736_v22 = vadd.f32 %v1537_v36, %v735_v21 }
  0xff   :  { %919 = vst.msk [vmem:[%s2185_s6 + $0xd8] sm:$0xff] %vm891_vm2, %v744_v18  ;;  %v1130_v23 = vpop.f32.mrf.mxu0  ;;  %v1196_v25 = vpop.f32.mrf.mxu1 }
 0x100   :  { %548 = vst.msk [vmem:[%s2184_s5 + $0xc8] sm:$0xff] %vm522_vm1, %v367_v20  ;;  %v388_v24 = vadd.f32 %v1130_v23, %v1532_v35  ;;  %v757_v26 = vadd.f32 %v1196_v25, %v1537_v36 }
 0x101   :  { %917 = vst.msk [vmem:[%s2185_s6 + $0xc8] sm:$0xff] %vm891_vm2, %v736_v22  ;;  %v379_v27 = vpop.f32.mrf.mxu0  ;;  %v748_v29 = vpop.f32.mrf.mxu1 }
 0x102   :  { %553 = vst.msk [vmem:[%s2184_s5 + $0xf0] sm:$0xff] %vm522_vm1, %v388_v24  ;;  %v380_v28 = vadd.f32 %v1532_v35, %v379_v27  ;;  %v749_v30 = vadd.f32 %v1537_v36, %v748_v29 }
 0x103   :  { %922 = vst.msk [vmem:[%s2185_s6 + $0xf0] sm:$0xff] %vm891_vm2, %v757_v26  ;;  %v1131_v31 = vpop.f32.mrf.mxu0  ;;  %v1197_v33 = vpop.f32.mrf.mxu1 }
 0x104   :  { %551 = vst.msk [vmem:[%s2184_s5 + $0xe0] sm:$0xff] %vm522_vm1, %v380_v28  ;;  %v391_v32 = vadd.f32 %v1131_v31, %v1532_v35  ;;  %v760_v34 = vadd.f32 %v1197_v33, %v1537_v36 }
 0x105   :  { %920 = vst.msk [vmem:[%s2185_s6 + $0xe0] sm:$0xff] %vm891_vm2, %v749_v30  ;;  %v382_v37 = vpop.f32.mrf.mxu0  ;;  %v751_v39 = vpop.f32.mrf.mxu1 }
 0x106   :  { %554 = vst.msk [vmem:[%s2184_s5 + $0xf8] sm:$0xff] %vm522_vm1, %v391_v32  ;;  %v383_v38 = vadd.f32 %v1532_v35, %v382_v37  ;;  %v752_v40 = vadd.f32 %v1537_v36, %v751_v39 }
 0x107   :  { %923 = vst.msk [vmem:[%s2185_s6 + $0xf8] sm:$0xff] %vm891_vm2, %v760_v34  ;;  %v1134_v41 = vpop.f32.mrf.mxu0  ;;  %v1200_v43 = vpop.f32.mrf.mxu1 }
 0x108   :  { %552 = vst.msk [vmem:[%s2184_s5 + $0xe8] sm:$0xff] %vm522_vm1, %v383_v38  ;;  %v404_v42 = vadd.f32 %v1134_v41, %v1532_v35  ;;  %v773_v44 = vadd.f32 %v1200_v43, %v1537_v36 }
 0x109   :  { %921 = vst.msk [vmem:[%s2185_s6 + $0xe8] sm:$0xff] %vm891_vm2, %v752_v40  ;;  %v395_v45 = vpop.f32.mrf.mxu0  ;;  %v764_v47 = vpop.f32.mrf.mxu1 }
 0x10a   :  { %557 = vst.msk [vmem:[%s2184_s5 + $0x110] sm:$0xff] %vm522_vm1, %v404_v42  ;;  %v396_v46 = vadd.f32 %v1532_v35, %v395_v45  ;;  %v765_v48 = vadd.f32 %v1537_v36, %v764_v47 }
 0x10b   :  { %926 = vst.msk [vmem:[%s2185_s6 + $0x110] sm:$0xff] %vm891_vm2, %v773_v44  ;;  %v1135_v49 = vpop.f32.mrf.mxu0  ;;  %v1201_v51 = vpop.f32.mrf.mxu1 }
 0x10c   :  { %555 = vst.msk [vmem:[%s2184_s5 + $0x100] sm:$0xff] %vm522_vm1, %v396_v46  ;;  %v407_v50 = vadd.f32 %v1135_v49, %v1532_v35  ;;  %v776_v52 = vadd.f32 %v1201_v51, %v1537_v36 }
 0x10d   :  { %924 = vst.msk [vmem:[%s2185_s6 + $0x100] sm:$0xff] %vm891_vm2, %v765_v48  ;;  %v398_v53 = vpop.f32.mrf.mxu0  ;;  %v767_v55 = vpop.f32.mrf.mxu1 }
 0x10e   :  { %558 = vst.msk [vmem:[%s2184_s5 + $0x118] sm:$0xff] %vm522_vm1, %v407_v50  ;;  %v399_v54 = vadd.f32 %v1532_v35, %v398_v53  ;;  %v768_v56 = vadd.f32 %v1537_v36, %v767_v55 }
 0x10f   :  { %927 = vst.msk [vmem:[%s2185_s6 + $0x118] sm:$0xff] %vm891_vm2, %v776_v52  ;;  %v1138_v57 = vpop.f32.mrf.mxu0  ;;  %v1204_v59 = vpop.f32.mrf.mxu1 }
 0x110   :  { %556 = vst.msk [vmem:[%s2184_s5 + $0x108] sm:$0xff] %vm522_vm1, %v399_v54  ;;  %v420_v58 = vadd.f32 %v1138_v57, %v1532_v35  ;;  %v789_v60 = vadd.f32 %v1204_v59, %v1537_v36 }
 0x111   :  { %925 = vst.msk [vmem:[%s2185_s6 + $0x108] sm:$0xff] %vm891_vm2, %v768_v56  ;;  %v411_v61 = vpop.f32.mrf.mxu0  ;;  %v780_v63 = vpop.f32.mrf.mxu1 }
 0x112   :  { %561 = vst.msk [vmem:[%s2184_s5 + $0x130] sm:$0xff] %vm522_vm1, %v420_v58  ;;  %v412_v62 = vadd.f32 %v1532_v35, %v411_v61  ;;  %v781_v0 = vadd.f32 %v1537_v36, %v780_v63 }
 0x113   :  { %930 = vst.msk [vmem:[%s2185_s6 + $0x130] sm:$0xff] %vm891_vm2, %v789_v60  ;;  %v1139_v1 = vpop.f32.mrf.mxu0  ;;  %v1205_v3 = vpop.f32.mrf.mxu1 }
 0x114   :  { %559 = vst.msk [vmem:[%s2184_s5 + $0x120] sm:$0xff] %vm522_vm1, %v412_v62  ;;  %v423_v2 = vadd.f32 %v1139_v1, %v1532_v35  ;;  %v792_v4 = vadd.f32 %v1205_v3, %v1537_v36 }
 0x115   :  { %928 = vst.msk [vmem:[%s2185_s6 + $0x120] sm:$0xff] %vm891_vm2, %v781_v0  ;;  %v414_v5 = vpop.f32.mrf.mxu0  ;;  %v783_v7 = vpop.f32.mrf.mxu1 }
 0x116   :  { %562 = vst.msk [vmem:[%s2184_s5 + $0x138] sm:$0xff] %vm522_vm1, %v423_v2  ;;  %v415_v6 = vadd.f32 %v1532_v35, %v414_v5  ;;  %v784_v8 = vadd.f32 %v1537_v36, %v783_v7 }
 0x117   :  { %931 = vst.msk [vmem:[%s2185_s6 + $0x138] sm:$0xff] %vm891_vm2, %v792_v4  ;;  %v1142_v9 = vpop.f32.mrf.mxu0  ;;  %v1208_v11 = vpop.f32.mrf.mxu1 }
 0x118   :  { %560 = vst.msk [vmem:[%s2184_s5 + $0x128] sm:$0xff] %vm522_vm1, %v415_v6  ;;  %v436_v10 = vadd.f32 %v1142_v9, %v1532_v35  ;;  %v805_v12 = vadd.f32 %v1208_v11, %v1537_v36 }
 0x119   :  { %929 = vst.msk [vmem:[%s2185_s6 + $0x128] sm:$0xff] %vm891_vm2, %v784_v8  ;;  %v427_v13 = vpop.f32.mrf.mxu0  ;;  %v796_v15 = vpop.f32.mrf.mxu1 }
 0x11a   :  { %565 = vst.msk [vmem:[%s2184_s5 + $0x150] sm:$0xff] %vm522_vm1, %v436_v10  ;;  %v428_v14 = vadd.f32 %v1532_v35, %v427_v13  ;;  %v797_v16 = vadd.f32 %v1537_v36, %v796_v15 }
 0x11b   :  { %934 = vst.msk [vmem:[%s2185_s6 + $0x150] sm:$0xff] %vm891_vm2, %v805_v12  ;;  %v1143_v17 = vpop.f32.mrf.mxu0  ;;  %v1209_v19 = vpop.f32.mrf.mxu1 }
 0x11c   :  { %563 = vst.msk [vmem:[%s2184_s5 + $0x140] sm:$0xff] %vm522_vm1, %v428_v14  ;;  %v439_v18 = vadd.f32 %v1143_v17, %v1532_v35  ;;  %v808_v20 = vadd.f32 %v1209_v19, %v1537_v36 }
 0x11d   :  { %932 = vst.msk [vmem:[%s2185_s6 + $0x140] sm:$0xff] %vm891_vm2, %v797_v16  ;;  %v430_v21 = vpop.f32.mrf.mxu0  ;;  %v799_v23 = vpop.f32.mrf.mxu1 }
 0x11e   :  { %566 = vst.msk [vmem:[%s2184_s5 + $0x158] sm:$0xff] %vm522_vm1, %v439_v18  ;;  %v431_v22 = vadd.f32 %v1532_v35, %v430_v21  ;;  %v800_v24 = vadd.f32 %v1537_v36, %v799_v23 }
 0x11f   :  { %935 = vst.msk [vmem:[%s2185_s6 + $0x158] sm:$0xff] %vm891_vm2, %v808_v20  ;;  %v1146_v25 = vpop.f32.mrf.mxu0  ;;  %v1212_v27 = vpop.f32.mrf.mxu1 }
 0x120   :  { %564 = vst.msk [vmem:[%s2184_s5 + $0x148] sm:$0xff] %vm522_vm1, %v431_v22  ;;  %v452_v26 = vadd.f32 %v1146_v25, %v1532_v35  ;;  %v821_v28 = vadd.f32 %v1212_v27, %v1537_v36 }
 0x121   :  { %933 = vst.msk [vmem:[%s2185_s6 + $0x148] sm:$0xff] %vm891_vm2, %v800_v24  ;;  %v443_v29 = vpop.f32.mrf.mxu0  ;;  %v812_v31 = vpop.f32.mrf.mxu1 }
 0x122   :  { %569 = vst.msk [vmem:[%s2184_s5 + $0x170] sm:$0xff] %vm522_vm1, %v452_v26  ;;  %v444_v30 = vadd.f32 %v1532_v35, %v443_v29  ;;  %v813_v32 = vadd.f32 %v1537_v36, %v812_v31 }
 0x123   :  { %938 = vst.msk [vmem:[%s2185_s6 + $0x170] sm:$0xff] %vm891_vm2, %v821_v28  ;;  %v1147_v33 = vpop.f32.mrf.mxu0  ;;  %v1213_v37 = vpop.f32.mrf.mxu1 }
 0x124   :  { %567 = vst.msk [vmem:[%s2184_s5 + $0x160] sm:$0xff] %vm522_vm1, %v444_v30  ;;  %v455_v34 = vadd.f32 %v1147_v33, %v1532_v35  ;;  %v824_v38 = vadd.f32 %v1213_v37, %v1537_v36 }
 0x125   :  { %936 = vst.msk [vmem:[%s2185_s6 + $0x160] sm:$0xff] %vm891_vm2, %v813_v32  ;;  %v446_v39 = vpop.f32.mrf.mxu0  ;;  %v815_v41 = vpop.f32.mrf.mxu1 }
 0x126   :  { %570 = vst.msk [vmem:[%s2184_s5 + $0x178] sm:$0xff] %vm522_vm1, %v455_v34  ;;  %v447_v40 = vadd.f32 %v1532_v35, %v446_v39  ;;  %v816_v42 = vadd.f32 %v1537_v36, %v815_v41 }
 0x127   :  { %939 = vst.msk [vmem:[%s2185_s6 + $0x178] sm:$0xff] %vm891_vm2, %v824_v38  ;;  %v1150_v43 = vpop.f32.mrf.mxu0  ;;  %v1216_v45 = vpop.f32.mrf.mxu1 }
 0x128   :  { %568 = vst.msk [vmem:[%s2184_s5 + $0x168] sm:$0xff] %vm522_vm1, %v447_v40  ;;  %v468_v44 = vadd.f32 %v1150_v43, %v1532_v35  ;;  %v837_v46 = vadd.f32 %v1216_v45, %v1537_v36 }
 0x129   :  { %937 = vst.msk [vmem:[%s2185_s6 + $0x168] sm:$0xff] %vm891_vm2, %v816_v42  ;;  %v459_v47 = vpop.f32.mrf.mxu0  ;;  %v828_v49 = vpop.f32.mrf.mxu1 }
 0x12a   :  { %573 = vst.msk [vmem:[%s2184_s5 + $0x190] sm:$0xff] %vm522_vm1, %v468_v44  ;;  %v460_v48 = vadd.f32 %v1532_v35, %v459_v47  ;;  %v829_v50 = vadd.f32 %v1537_v36, %v828_v49 }
 0x12b   :  { %942 = vst.msk [vmem:[%s2185_s6 + $0x190] sm:$0xff] %vm891_vm2, %v837_v46  ;;  %v1151_v51 = vpop.f32.mrf.mxu0  ;;  %v1217_v53 = vpop.f32.mrf.mxu1 }
 0x12c   :  { %571 = vst.msk [vmem:[%s2184_s5 + $0x180] sm:$0xff] %vm522_vm1, %v460_v48  ;;  %v471_v52 = vadd.f32 %v1151_v51, %v1532_v35  ;;  %v840_v54 = vadd.f32 %v1217_v53, %v1537_v36 }
 0x12d   :  { %940 = vst.msk [vmem:[%s2185_s6 + $0x180] sm:$0xff] %vm891_vm2, %v829_v50  ;;  %v462_v55 = vpop.f32.mrf.mxu0  ;;  %v831_v57 = vpop.f32.mrf.mxu1 }
 0x12e   :  { %574 = vst.msk [vmem:[%s2184_s5 + $0x198] sm:$0xff] %vm522_vm1, %v471_v52  ;;  %v463_v56 = vadd.f32 %v1532_v35, %v462_v55  ;;  %v832_v58 = vadd.f32 %v1537_v36, %v831_v57 }
 0x12f   :  { %943 = vst.msk [vmem:[%s2185_s6 + $0x198] sm:$0xff] %vm891_vm2, %v840_v54  ;;  %v1154_v59 = vpop.f32.mrf.mxu0  ;;  %v1220_v61 = vpop.f32.mrf.mxu1 }
 0x130   :  { %572 = vst.msk [vmem:[%s2184_s5 + $0x188] sm:$0xff] %vm522_vm1, %v463_v56  ;;  %v484_v60 = vadd.f32 %v1154_v59, %v1532_v35  ;;  %v853_v62 = vadd.f32 %v1220_v61, %v1537_v36 }
 0x131   :  { %941 = vst.msk [vmem:[%s2185_s6 + $0x188] sm:$0xff] %vm891_vm2, %v832_v58  ;;  %v475_v63 = vpop.f32.mrf.mxu0  ;;  %v844_v1 = vpop.f32.mrf.mxu1 }
 0x132   :  { %577 = vst.msk [vmem:[%s2184_s5 + $0x1b0] sm:$0xff] %vm522_vm1, %v484_v60  ;;  %v476_v0 = vadd.f32 %v1532_v35, %v475_v63  ;;  %v845_v2 = vadd.f32 %v1537_v36, %v844_v1 }
 0x133   :  { %946 = vst.msk [vmem:[%s2185_s6 + $0x1b0] sm:$0xff] %vm891_vm2, %v853_v62  ;;  %v1155_v3 = vpop.f32.mrf.mxu0  ;;  %v1221_v5 = vpop.f32.mrf.mxu1 }
 0x134   :  { %575 = vst.msk [vmem:[%s2184_s5 + $0x1a0] sm:$0xff] %vm522_vm1, %v476_v0  ;;  %v487_v4 = vadd.f32 %v1155_v3, %v1532_v35  ;;  %v856_v6 = vadd.f32 %v1221_v5, %v1537_v36 }
 0x135   :  { %944 = vst.msk [vmem:[%s2185_s6 + $0x1a0] sm:$0xff] %vm891_vm2, %v845_v2  ;;  %v478_v7 = vpop.f32.mrf.mxu0  ;;  %v847_v9 = vpop.f32.mrf.mxu1 }
 0x136   :  { %578 = vst.msk [vmem:[%s2184_s5 + $0x1b8] sm:$0xff] %vm522_vm1, %v487_v4  ;;  %v479_v8 = vadd.f32 %v1532_v35, %v478_v7  ;;  %v848_v10 = vadd.f32 %v1537_v36, %v847_v9 }
 0x137   :  { %947 = vst.msk [vmem:[%s2185_s6 + $0x1b8] sm:$0xff] %vm891_vm2, %v856_v6  ;;  %v1158_v11 = vpop.f32.mrf.mxu0  ;;  %v1224_v13 = vpop.f32.mrf.mxu1 }
 0x138   :  { %576 = vst.msk [vmem:[%s2184_s5 + $0x1a8] sm:$0xff] %vm522_vm1, %v479_v8  ;;  %v500_v12 = vadd.f32 %v1158_v11, %v1532_v35  ;;  %v869_v14 = vadd.f32 %v1224_v13, %v1537_v36 }
 0x139   :  { %945 = vst.msk [vmem:[%s2185_s6 + $0x1a8] sm:$0xff] %vm891_vm2, %v848_v10  ;;  %v491_v15 = vpop.f32.mrf.mxu0  ;;  %v860_v17 = vpop.f32.mrf.mxu1 }
 0x13a   :  { %581 = vst.msk [vmem:[%s2184_s5 + $0x1d0] sm:$0xff] %vm522_vm1, %v500_v12  ;;  %v492_v16 = vadd.f32 %v1532_v35, %v491_v15  ;;  %v861_v18 = vadd.f32 %v1537_v36, %v860_v17 }
 0x13b   :  { %950 = vst.msk [vmem:[%s2185_s6 + $0x1d0] sm:$0xff] %vm891_vm2, %v869_v14  ;;  %v1159_v19 = vpop.f32.mrf.mxu0  ;;  %v1225_v21 = vpop.f32.mrf.mxu1 }
 0x13c   :  { %579 = vst.msk [vmem:[%s2184_s5 + $0x1c0] sm:$0xff] %vm522_vm1, %v492_v16  ;;  %v503_v20 = vadd.f32 %v1159_v19, %v1532_v35  ;;  %v872_v22 = vadd.f32 %v1225_v21, %v1537_v36 }
 0x13d   :  { %948 = vst.msk [vmem:[%s2185_s6 + $0x1c0] sm:$0xff] %vm891_vm2, %v861_v18  ;;  %v494_v23 = vpop.f32.mrf.mxu0  ;;  %v863_v25 = vpop.f32.mrf.mxu1 }
 0x13e   :  { %582 = vst.msk [vmem:[%s2184_s5 + $0x1d8] sm:$0xff] %vm522_vm1, %v503_v20  ;;  %v495_v24 = vadd.f32 %v1532_v35, %v494_v23  ;;  %v864_v26 = vadd.f32 %v1537_v36, %v863_v25 }
 0x13f   :  { %951 = vst.msk [vmem:[%s2185_s6 + $0x1d8] sm:$0xff] %vm891_vm2, %v872_v22  ;;  %v1162_v27 = vpop.f32.mrf.mxu0  ;;  %v1228_v29 = vpop.f32.mrf.mxu1 }
 0x140   :  { %580 = vst.msk [vmem:[%s2184_s5 + $0x1c8] sm:$0xff] %vm522_vm1, %v495_v24  ;;  %v516_v28 = vadd.f32 %v1162_v27, %v1532_v35  ;;  %v885_v30 = vadd.f32 %v1228_v29, %v1537_v36 }
 0x141   :  { %949 = vst.msk [vmem:[%s2185_s6 + $0x1c8] sm:$0xff] %vm891_vm2, %v864_v26  ;;  %v507_v31 = vpop.f32.mrf.mxu0  ;;  %v876_v33 = vpop.f32.mrf.mxu1 }
 0x142   :  { %585 = vst.msk [vmem:[%s2184_s5 + $0x1f0] sm:$0xff] %vm522_vm1, %v516_v28  ;;  %v508_v32 = vadd.f32 %v1532_v35, %v507_v31  ;;  %v877_v34 = vadd.f32 %v1537_v36, %v876_v33 }
 0x143   :  { %954 = vst.msk [vmem:[%s2185_s6 + $0x1f0] sm:$0xff] %vm891_vm2, %v885_v30  ;;  %v1163_v37 = vpop.f32.mrf.mxu0  ;;  %v1229_v39 = vpop.f32.mrf.mxu1 }
 0x144   :  { %583 = vst.msk [vmem:[%s2184_s5 + $0x1e0] sm:$0xff] %vm522_vm1, %v508_v32  ;;  %v519_v38 = vadd.f32 %v1163_v37, %v1532_v35  ;;  %v888_v40 = vadd.f32 %v1229_v39, %v1537_v36 }
 0x145   :  { %952 = vst.msk [vmem:[%s2185_s6 + $0x1e0] sm:$0xff] %vm891_vm2, %v877_v34  ;;  %v510_v41 = vpop.f32.mrf.mxu0  ;;  %v879_v43 = vpop.f32.mrf.mxu1 }
 0x146   :  { %586 = vst.msk [vmem:[%s2184_s5 + $0x1f8] sm:$0xff] %vm522_vm1, %v519_v38  ;;  %v511_v42 = vadd.f32 %v1532_v35, %v510_v41  ;;  %v880_v44 = vadd.f32 %v1537_v36, %v879_v43 }
 0x147   :  { %955 = vst.msk [vmem:[%s2185_s6 + $0x1f8] sm:$0xff] %vm891_vm2, %v888_v40 }
 0x148   :  { %584 = vst.msk [vmem:[%s2184_s5 + $0x1e8] sm:$0xff] %vm522_vm1, %v511_v42 }
 0x149   :  { %953 = vst.msk [vmem:[%s2185_s6 + $0x1e8] sm:$0xff] %vm891_vm2, %v880_v44 }

</bundles_post_ra>
